<compile_context>
chip_gen: v5e
topology: v5e:2x2
jax: 0.10.0
libtpu: 0.0.40
codegen_flags: <defaults>
</compile_context>

<pallas_src>
import functools

import jax
import jax.numpy as jnp
from jax.experimental import pallas as pl
from jax.experimental.pallas import tpu as pltpu


def _round_up(x, m):
    return (x + m - 1) // m * m


def _vmem_limit_bytes(needed_bytes):
    """Size the VMEM request to actual need (+ headroom), capped per TPU generation."""
    try:
        cap = int(getattr(pltpu.get_tpu_info(), "vmem_capacity_bytes", 64 * 2**20))
    except Exception:
        cap = 64 * 2**20                      # conservative (v7x per-TC) fallback
    gen_cap = int(cap * 4 // 5)               # leave compiler-scratch headroom
    want = max(2 * int(needed_bytes), 32 * 2**20)
    return max(min(want, gen_cap), 16 * 2**20)


def _shared_mlp_kernel(x_ref, w1_ref, b1_ref, g_ref, bt_ref, w2_ref, b2_ref, o_ref,
                       *, eps, hidden, hid_p):
    # x_ref : (TM, d_in)   streamed row tile (compute dtype, e.g. bf16)
    # w1_ref: (d_in, Hp)   VMEM-resident, compute dtype
    # b1/g/bt: (1, Hp) f32 VMEM-resident
    # w2_ref: (Hp, d_out)  VMEM-resident, compute dtype
    # b2_ref: (1, d_out) f32
    # o_ref : (TM, d_out)
    x = x_ref[...]

    # Linear 1 on the MXU (bf16 operands, f32 accumulation). Padded hidden columns of h are 0.
    h = jnp.dot(x, w1_ref[...], preferred_element_type=jnp.float32) + b1_ref[...]

    # LayerNorm over the true hidden width, two-pass variance (cancellation-safe).
    inv_h = 1.0 / hidden
    mu = jnp.sum(h, axis=-1, keepdims=True) * inv_h
    d = h - mu
    if hid_p != hidden:
        # Zero the padded columns so they do not contribute to the variance.
        col = jax.lax.broadcasted_iota(jnp.int32, d.shape, 1)
        d = jnp.where(col < hidden, d, 0.0)
    var = jnp.sum(d * d, axis=-1, keepdims=True) * inv_h
    hn = d * jax.lax.rsqrt(var + eps)
    hn = hn * g_ref[...] + bt_ref[...]        # padded gamma/beta are zero -> padded cols stay 0

    # ReLU
    a = jnp.maximum(hn, 0.0)

    # Dropout: identity (eval mode).

    # Linear 2 on the MXU (bf16 operands, f32 accumulation).
    y = jnp.dot(a.astype(w2_ref.dtype), w2_ref[...],
                preferred_element_type=jnp.float32) + b2_ref[...]

    o_ref[...] = y.astype(o_ref.dtype)


def shared_mlp(x, params, *, tile_m=512, eps=1e-5, compute_dtype=jnp.bfloat16):
    """x: [B, N, D_in] -> [B, N, D_out] (eval-mode SharedMLP forward)."""
    w1, b1, gamma, beta, w2, b2 = params
    B, N, d_in = x.shape
    hidden = w1.shape[1]
    d_out = w2.shape[1]
    out_dtype = x.dtype
    if compute_dtype is None:
        compute_dtype = x.dtype

    hid_p = _round_up(hidden, 128)            # only the resident params get lane padding

    M = B * N
    tile_m = max(8, _round_up(tile_m, 8))
    tile_m = min(tile_m, _round_up(M, 8))
    # Megacore: aim for >= 2 row tiles so the "parallel" axis spans both v7x TensorCores.
    if pl.cdiv(M, tile_m) < 2 and M > 8:
        tile_m = _round_up(pl.cdiv(M, 2), 8)
    n_tiles = pl.cdiv(M, tile_m)

    # Streamed array: view + single cast, no padding copies; ragged rows handled by Pallas.
    x2 = x.reshape(M, d_in).astype(compute_dtype)

    # Resident weights / LN params: pad hidden, cast once on the host (no in-kernel casts).
    w1p = jnp.pad(w1, ((0, 0), (0, hid_p - hidden))).astype(compute_dtype)
    w2p = jnp.pad(w2, ((0, hid_p - hidden), (0, 0))).astype(compute_dtype)
    b1p = jnp.pad(b1.reshape(1, hidden), ((0, 0), (0, hid_p - hidden))).astype(jnp.float32)
    gp = jnp.pad(gamma.reshape(1, hidden), ((0, 0), (0, hid_p - hidden))).astype(jnp.float32)
    btp = jnp.pad(beta.reshape(1, hidden), ((0, 0), (0, hid_p - hidden))).astype(jnp.float32)
    b2p = b2.reshape(1, d_out).astype(jnp.float32)

    kernel = functools.partial(_shared_mlp_kernel, eps=eps, hidden=hidden, hid_p=hid_p)

    # Grid-invariant operands: whole-array, VMEM-resident (no per-step re-DMA / double buffer).
    resident = pl.BlockSpec(memory_space=pltpu.MemorySpace.VMEM)

    cbytes = jnp.dtype(compute_dtype).itemsize
    need = ((w1p.size + w2p.size) * cbytes
            + (b1p.size + gp.size + btp.size + b2p.size) * 4
            + 2 * tile_m * d_in * cbytes                         # double-buffered x tiles
            + 2 * tile_m * d_out * jnp.dtype(out_dtype).itemsize  # double-buffered out tiles
            + 4 * tile_m * hid_p * 4)                             # f32 intermediates

    out2 = pl.pallas_call(
        kernel,
        out_shape=jax.ShapeDtypeStruct((M, d_out), out_dtype),
        grid_spec=pltpu.PrefetchScalarGridSpec(
            num_scalar_prefetch=0,
            grid=(n_tiles,),
            in_specs=[
                pl.BlockSpec((tile_m, d_in), lambda i: (i, 0)),   # x row tiles (pipelined)
                resident,   # W1
                resident,   # b1
                resident,   # ln gamma
                resident,   # ln beta
                resident,   # W2
                resident,   # b2
            ],
            out_specs=pl.BlockSpec((tile_m, d_out), lambda i: (i, 0)),
        ),
        compiler_params=pltpu.CompilerParams(
            dimension_semantics=("parallel",),
            vmem_limit_bytes=_vmem_limit_bytes(need),
        ),
    )(x2, w1p, b1p, gp, btp, w2p, b2p)

    return out2.reshape(B, N, d_out)


def init_params(key, input_dim, hidden_dim, output_dim, dtype=jnp.float32):
    """Deterministic init mimicking PyTorch defaults (uniform +/- 1/sqrt(fan_in))."""
    k1, k2, k3, k4 = jax.random.split(key, 4)
    bound1 = 1.0 / (input_dim ** 0.5)
    bound2 = 1.0 / (hidden_dim ** 0.5)
    w1 = jax.random.uniform(k1, (input_dim, hidden_dim), dtype, -bound1, bound1)
    b1 = jax.random.uniform(k2, (1, hidden_dim), dtype, -bound1, bound1)
    gamma = jnp.ones((1, hidden_dim), dtype)
    beta = jnp.zeros((1, hidden_dim), dtype)
    w2 = jax.random.uniform(k3, (hidden_dim, output_dim), dtype, -bound2, bound2)
    b2 = jax.random.uniform(k4, (1, output_dim), dtype, -bound2, bound2)
    return (w1, b1, gamma, beta, w2, b2)


def _ref_forward(x, params, eps=1e-5, compute_dtype=jnp.bfloat16):
    """Pure-JAX reference mirroring the kernel's bf16-operand / f32-accumulate compute."""
    w1, b1, gamma, beta, w2, b2 = params
    xc = x.astype(compute_dtype) if compute_dtype is not None else x
    w1c = w1.astype(compute_dtype) if compute_dtype is not None else w1
    w2c = w2.astype(compute_dtype) if compute_dtype is not None else w2
    h = jnp.dot(xc, w1c, preferred_element_type=jnp.float32) + b1.astype(jnp.float32)
    mu = jnp.mean(h, axis=-1, keepdims=True)
    d = h - mu
    var = jnp.mean(d * d, axis=-1, keepdims=True)
    hn = d * jax.lax.rsqrt(var + eps)
    hn = hn * gamma.astype(jnp.float32) + beta.astype(jnp.float32)
    a = jnp.maximum(hn, 0.0)
    ac = a.astype(compute_dtype) if compute_dtype is not None else a
    y = jnp.dot(ac, w2c, preferred_element_type=jnp.float32) + b2.astype(jnp.float32)
    return y.astype(x.dtype)


if __name__ == "__main__":
    key = jax.random.PRNGKey(0)
    kx, kp = jax.random.split(key)

    B, N = 2, 64          # 128 rows total -> splits into two 64-row tiles (megacore-friendly)
    input_dim, hidden_dim, output_dim = 16, 32, 8

    x = jax.random.normal(kx, (B, N, input_dim), dtype=jnp.float32)
    params = init_params(kp, input_dim, hidden_dim, output_dim)

    out = shared_mlp(x, params)
    out = jax.block_until_ready(out)

    ref = _ref_forward(x, params, compute_dtype=jnp.bfloat16)
    assert out.shape == (B, N, output_dim), out.shape
    max_err = float(jnp.max(jnp.abs(out - ref)))
    assert jnp.allclose(out, ref, atol=5e-3, rtol=5e-3), max_err

    print("KERNEL_OK")
</pallas_src>

<mosaic_0001>
module attributes {stable_mosaic.version = 11 : i64} {
  func.func @_shared_mlp_kernel(%arg0: i32, %arg1: memref<64x16xbf16, #tpu.memory_space<vmem>>, %arg2: memref<16x128xbf16, #tpu.memory_space<vmem>>, %arg3: memref<1x128xf32, #tpu.memory_space<vmem>>, %arg4: memref<1x128xf32, #tpu.memory_space<vmem>>, %arg5: memref<1x128xf32, #tpu.memory_space<vmem>>, %arg6: memref<128x8xbf16, #tpu.memory_space<vmem>>, %arg7: memref<1x8xf32, #tpu.memory_space<vmem>>, %arg8: memref<64x8xf32, #tpu.memory_space<vmem>>) attributes {dimension_semantics = [#tpu.dimension_semantics<parallel>], iteration_bounds = array<i64: 2>, scalar_prefetch = 0 : i64, scratch_operands = 0 : i64, tpu.core_type = #tpu.core_type<tc>, window_params = [{transform_indices = @transform_0, window_bounds = array<i64: 64, 16>}, {pipeline_mode = #tpu.pipeline_mode<synchronous>, transform_indices = @transform_1, window_bounds = array<i64: 16, 128>}, {pipeline_mode = #tpu.pipeline_mode<synchronous>, transform_indices = @transform_2, window_bounds = array<i64: 1, 128>}, {pipeline_mode = #tpu.pipeline_mode<synchronous>, transform_indices = @transform_3, window_bounds = array<i64: 1, 128>}, {pipeline_mode = #tpu.pipeline_mode<synchronous>, transform_indices = @transform_4, window_bounds = array<i64: 1, 128>}, {pipeline_mode = #tpu.pipeline_mode<synchronous>, transform_indices = @transform_5, window_bounds = array<i64: 128, 8>}, {pipeline_mode = #tpu.pipeline_mode<synchronous>, transform_indices = @transform_6, window_bounds = array<i64: 1, 8>}, {transform_indices = @transform_7, window_bounds = array<i64: 64, 8>}]} {
    %c0 = arith.constant 0 : index
    %c0_0 = arith.constant 0 : index
    %0 = vector.load %arg1[%c0, %c0_0] : memref<64x16xbf16, #tpu.memory_space<vmem>>, vector<64x16xbf16>
    %c0_1 = arith.constant 0 : index
    %c0_2 = arith.constant 0 : index
    %1 = vector.load %arg2[%c0_1, %c0_2] : memref<16x128xbf16, #tpu.memory_space<vmem>>, vector<16x128xbf16>
    %cst = arith.constant dense<0.000000e+00> : vector<64x128xf32>
    %2 = tpu.matmul %0, %1, %cst {dimension_numbers = #tpu.dot_dimension_numbers<[1], [0], [0], [1], [0, 0, 1, 1], [], []>} : vector<64x16xbf16>, vector<16x128xbf16>, vector<64x128xf32> -> vector<64x128xf32>
    %c0_3 = arith.constant 0 : index
    %c0_4 = arith.constant 0 : index
    %3 = vector.load %arg3[%c0_3, %c0_4] : memref<1x128xf32, #tpu.memory_space<vmem>>, vector<1x128xf32>
    %4 = vector.broadcast %3 : vector<1x128xf32> to vector<64x128xf32>
    %5 = arith.addf %2, %4 : vector<64x128xf32>
    %cst_5 = arith.constant dense<0.000000e+00> : vector<64xf32>
    %6 = vector.multi_reduction <add>, %5, %cst_5 [1] : vector<64x128xf32> to vector<64xf32>
    %7 = vector.shape_cast %6 : vector<64xf32> to vector<64x1xf32>
    %cst_6 = arith.constant 3.125000e-02 : f32
    %8 = vector.broadcast %cst_6 : f32 to vector<64x1xf32>
    %9 = arith.mulf %7, %8 : vector<64x1xf32>
    %10 = vector.broadcast %9 : vector<64x1xf32> to vector<64x128xf32>
    %11 = arith.subf %5, %10 : vector<64x128xf32>
    %12 = tpu.iota {dimensions = array<i32: 1>} : vector<64x128xi32>
    %c32_i32 = arith.constant 32 : i32
    %13 = vector.broadcast %c32_i32 : i32 to vector<64x128xi32>
    %14 = arith.cmpi slt, %12, %13 : vector<64x128xi32>
    %cst_7 = arith.constant 0.000000e+00 : f32
    %15 = vector.broadcast %cst_7 : f32 to vector<64x128xf32>
    %16 = arith.select %14, %11, %15 : vector<64x128xi1>, vector<64x128xf32>
    %17 = arith.mulf %16, %16 : vector<64x128xf32>
    %cst_8 = arith.constant dense<0.000000e+00> : vector<64xf32>
    %18 = vector.multi_reduction <add>, %17, %cst_8 [1] : vector<64x128xf32> to vector<64xf32>
    %19 = vector.shape_cast %18 : vector<64xf32> to vector<64x1xf32>
    %cst_9 = arith.constant 3.125000e-02 : f32
    %20 = vector.broadcast %cst_9 : f32 to vector<64x1xf32>
    %21 = arith.mulf %19, %20 : vector<64x1xf32>
    %cst_10 = arith.constant 9.99999974E-6 : f32
    %22 = vector.broadcast %cst_10 : f32 to vector<64x1xf32>
    %23 = arith.addf %21, %22 : vector<64x1xf32>
    %24 = math.rsqrt %23 : vector<64x1xf32>
    %25 = vector.broadcast %24 : vector<64x1xf32> to vector<64x128xf32>
    %26 = arith.mulf %16, %25 : vector<64x128xf32>
    %c0_11 = arith.constant 0 : index
    %c0_12 = arith.constant 0 : index
    %27 = vector.load %arg4[%c0_11, %c0_12] : memref<1x128xf32, #tpu.memory_space<vmem>>, vector<1x128xf32>
    %28 = vector.broadcast %27 : vector<1x128xf32> to vector<64x128xf32>
    %29 = arith.mulf %26, %28 : vector<64x128xf32>
    %c0_13 = arith.constant 0 : index
    %c0_14 = arith.constant 0 : index
    %30 = vector.load %arg5[%c0_13, %c0_14] : memref<1x128xf32, #tpu.memory_space<vmem>>, vector<1x128xf32>
    %31 = vector.broadcast %30 : vector<1x128xf32> to vector<64x128xf32>
    %32 = arith.addf %29, %31 : vector<64x128xf32>
    %cst_15 = arith.constant 0.000000e+00 : f32
    %33 = vector.broadcast %cst_15 : f32 to vector<64x128xf32>
    %34 = arith.maximumf %32, %33 : vector<64x128xf32>
    %35 = arith.truncf %34 : vector<64x128xf32> to vector<64x128xbf16>
    %c0_16 = arith.constant 0 : index
    %c0_17 = arith.constant 0 : index
    %36 = vector.load %arg6[%c0_16, %c0_17] : memref<128x8xbf16, #tpu.memory_space<vmem>>, vector<128x8xbf16>
    %cst_18 = arith.constant dense<0.000000e+00> : vector<64x8xf32>
    %37 = tpu.matmul %35, %36, %cst_18 {dimension_numbers = #tpu.dot_dimension_numbers<[1], [0], [0], [1], [0, 0, 1, 1], [], []>} : vector<64x128xbf16>, vector<128x8xbf16>, vector<64x8xf32> -> vector<64x8xf32>
    %c0_19 = arith.constant 0 : index
    %c0_20 = arith.constant 0 : index
    %38 = vector.load %arg7[%c0_19, %c0_20] : memref<1x8xf32, #tpu.memory_space<vmem>>, vector<1x8xf32>
    %39 = vector.broadcast %38 : vector<1x8xf32> to vector<64x8xf32>
    %40 = arith.addf %37, %39 : vector<64x8xf32>
    %c0_21 = arith.constant 0 : index
    %c0_22 = arith.constant 0 : index
    %41 = vector.load %arg8[%c0_21, %c0_22] : memref<64x8xf32, #tpu.memory_space<vmem>>, vector<64x8xf32>
    tpu.vector_store %arg8[%c0_21, %c0_22], %40 {strides = array<i32>} : memref<64x8xf32, #tpu.memory_space<vmem>>, vector<64x8xf32>,
    return
  }
  func.func @transform_0(%arg0: i32) -> (i32, i32) {
    %c0_i32 = arith.constant 0 : i32
    %c0_i32_0 = arith.constant 0 : i32
    return %arg0, %c0_i32 : i32, i32
  }
  func.func @transform_1(%arg0: i32) -> (i32, i32) {
    %c0_i32 = arith.constant 0 : i32
    %c0_i32_0 = arith.constant 0 : i32
    %c0_i32_1 = arith.constant 0 : i32
    return %c0_i32, %c0_i32_0 : i32, i32
  }
  func.func @transform_2(%arg0: i32) -> (i32, i32) {
    %c0_i32 = arith.constant 0 : i32
    %c0_i32_0 = arith.constant 0 : i32
    %c0_i32_1 = arith.constant 0 : i32
    return %c0_i32, %c0_i32_0 : i32, i32
  }
  func.func @transform_3(%arg0: i32) -> (i32, i32) {
    %c0_i32 = arith.constant 0 : i32
    %c0_i32_0 = arith.constant 0 : i32
    %c0_i32_1 = arith.constant 0 : i32
    return %c0_i32, %c0_i32_0 : i32, i32
  }
  func.func @transform_4(%arg0: i32) -> (i32, i32) {
    %c0_i32 = arith.constant 0 : i32
    %c0_i32_0 = arith.constant 0 : i32
    %c0_i32_1 = arith.constant 0 : i32
    return %c0_i32, %c0_i32_0 : i32, i32
  }
  func.func @transform_5(%arg0: i32) -> (i32, i32) {
    %c0_i32 = arith.constant 0 : i32
    %c0_i32_0 = arith.constant 0 : i32
    %c0_i32_1 = arith.constant 0 : i32
    return %c0_i32, %c0_i32_0 : i32, i32
  }
  func.func @transform_6(%arg0: i32) -> (i32, i32) {
    %c0_i32 = arith.constant 0 : i32
    %c0_i32_0 = arith.constant 0 : i32
    %c0_i32_1 = arith.constant 0 : i32
    return %c0_i32, %c0_i32_0 : i32, i32
  }
  func.func @transform_7(%arg0: i32) -> (i32, i32) {
    %c0_i32 = arith.constant 0 : i32
    %c0_i32_0 = arith.constant 0 : i32
    return %arg0, %c0_i32 : i32, i32
  }
}

</mosaic_0001>

<bundles_post_ra>
// kernel: tpu_custom_call.1
= control target key start
LH: loop header
LB: loop body
LE: loop exit
PB: predicated region body
PF: predicated region fallthrough
CT: control target
= control target key end

     0   :  { %s907_s24 = smov 0   ;;  %s1065_s0 = inlined_call_operand.vmem [shape: bf16[128,16], index: 0, kind: input, shape index: {}]   ;;  %s1066_s1 = inlined_call_operand.vmem [shape: bf16[16,128], index: 1, kind: input, shape index: {}]   ;;  %s1067_s2 = inlined_call_operand.vmem [shape: f32[1,128], index: 2, kind: input, shape index: {}]   ;;  %s1068_s3 = inlined_call_operand.vmem [shape: f32[1,128], index: 3, kind: input, shape index: {}]   ;;  %s1069_s4 = inlined_call_operand.vmem [shape: f32[1,128], index: 4, kind: input, shape index: {}]   ;;  %s1070_s5 = inlined_call_operand.vmem [shape: bf16[128,8], index: 5, kind: input, shape index: {}]   ;;  %s1071_s6 = inlined_call_operand.vmem [shape: f32[1,8], index: 6, kind: input, shape index: {}]   ;;  %s1072_s7 = inlined_call_operand.vmem [shape: f32[128,8], index: 7, kind: output, shape index: {}]  }
   0x1 LB: > { %s734_s25 = sadd.s32 4294967295, %s865_s24   ;;  %p738_p0 = scmp.ge.s32.totalorder %s865_s24, 1  ;;  %s865_s24 = sphi %s907_s24, %s17_s24  }
   0x2   : > { %p238_p1 = scmp.lt.s32.totalorder %s865_s24, 3 }
   0x4   : > { %p239_p2 = pnand %p738_p0, %p238_p1 }
   0x5   : > { %s739_s28 = sshll.u32 (!%p239_p2), %s734_s25, 3 }
   0x6   : > { %242 = sbr.rel (%p239_p2) target bundleno = 606 (0x25e), region = 48  ;;  %p271_p3 = scmp.lt.s32.totalorder (!%p239_p2), %s739_s28, 15 }
   0xb   : > { %v805_v0 = vld [vmem:[%s1066_s1] sm:$0xff]  ;;  %s1076_s28 = smov (!%p271_p3, %s739_s28), 15  ;;  %vm323_vm0 = vcmask 130048   ;;  %v397_v22 = vlaneseq }
   0xc   : > { %343 = vmatpush.bf16.msra.mxu0 %v805_v0  ;;  %814 = vmatpush.bf16.msra.mxu3 %v805_v0  ;;  %s740_s29 = sshll.u32 %s1076_s28, 2  ;;  %v839_v5 = vld [vmem:[%s1067_s2] ss:$0 sm:$0xff]  ;;  %v813_v0 = vld [vmem:[%s1070_s5 + $0x38] sm:$0xff]  ;;  %s742_s11 = sshll.u32 %s1076_s28, 3 }
   0xd   : > { %s274_s9 = scalar_lea.vmem %s1065_s0, %s740_s29  ;;  %v398_v24 = vand.u32 127, %v397_v22  ;;  %816 = vmatpush.bf16.msra.mxu2 %v813_v0  ;;  %815 = vmatpush.bf16.msra.mxu1 %v813_v0  ;;  %s280_s16 = scalar_lea.vmem %s1072_s7, %s742_s11 }
   0xe   : > { %v801_v1 = vld [vmem:[%s274_s9] sm:$0xff]  ;;  %v802_v2 = vld [vmem:[%s274_s9 + $0x8] sm:$0xff]  ;;  %v803_v3 = vld [vmem:[%s274_s9 + $0x10] sm:$0xff] }
   0xf   : > { %763 = vmatmul.msk.bf16.vlgmr.msra.gmra.mxu0 %vm323_vm0, %v801_v1  ;;  %764 = vmatmul.msk.bf16.vlgmr.msra.gmra.mxu3 %vm323_vm0, %v802_v2  ;;  %v804_v4 = vld [vmem:[%s274_s9 + $0x18] sm:$0xff]  ;;  %vm399_vm1 = vcmp.lt.s32.totalorder %v398_v24, 32  ;;  %v812_v1 = vld [vmem:[%s1070_s5 + $0x30] sm:$0xff]  ;;  %v811_v2 = vld [vmem:[%s1070_s5 + $0x28] sm:$0xff] }
  0x10   : > { %640 = vmatpush.bf16.msrb.mxu0 %v813_v0 }
  0x11   : > { %818 = vmatpush.bf16.msra.mxu2 %v812_v1  ;;  %817 = vmatpush.bf16.msra.mxu1 %v812_v1 }
  0x14   : > { %641 = vmatpush.bf16.msrb.mxu0 %v812_v1 }
  0x15   : > { %820 = vmatpush.bf16.msra.mxu2 %v811_v2  ;;  %819 = vmatpush.bf16.msra.mxu1 %v811_v2 }
  0x18   : > { %642 = vmatpush.bf16.msrb.mxu0 %v811_v2 }
  0x1f   : > { %765 = vmatmul.msk.bf16.gmra.mxu3 %vm323_vm0, %v803_v3  ;;  %v810_v3 = vld [vmem:[%s1070_s5 + $0x20] sm:$0xff] }
  0x20   : > { %822 = vmatpush.bf16.msra.mxu2 %v810_v3  ;;  %643 = vmatpush.bf16.msrb.mxu0 %v810_v3 }
  0x21   : > { %821 = vmatpush.bf16.msra.mxu1 %v810_v3 }
  0x2f   : > { %766 = vmatmul.msk.bf16.gmra.mxu3 %vm323_vm0, %v804_v4  ;;  %v809_v4 = vld [vmem:[%s1070_s5 + $0x18] sm:$0xff] }
  0x30   : > { %824 = vmatpush.bf16.msra.mxu2 %v809_v4  ;;  %644 = vmatpush.bf16.msrb.mxu0 %v809_v4 }
  0x31   : > { %823 = vmatpush.bf16.msra.mxu1 %v809_v4 }
  0x8c   : > { %v345_v6 = vpop.f32.mrf.mxu0 }
  0x8d   : > { %v346_v7 = vadd.f32 %v839_v5, %v345_v6 }
  0x8f   : > { %365 = vadd.xlane.f32.xlu2 %v346_v7 }
  0x92   : > { %v350_v8 = vpop.f32.mrf.mxu3 }
  0x93   : > { %v351_v17 = vadd.f32 %v839_v5, %v350_v8  ;;  %v807_v8 = vld [vmem:[%s1070_s5 + $0x8] sm:$0xff] }
  0x94   : > { %v347_v9 = vpop.f32.mrf.mxu0 }
  0x95   : > { %v348_v10 = vadd.f32 %v839_v5, %v347_v9 }
  0x97   : > { %367 = vadd.xlane.f32.xlu2 %v348_v10 }
  0x9a   : > { %v352_v11 = vpop.f32.mrf.mxu3 }
  0x9b   : > { %v353_v21 = vadd.f32 %v839_v5, %v352_v11 }
  0xa2   : > { %v355_v12 = vpop.f32.mrf.mxu3 }
  0xa3   : > { %v356_v13 = vadd.f32 %v839_v5, %v355_v12 }
  0xa5   : > { %373 = vadd.xlane.f32.xlu0 %v356_v13 }
  0xaa   : > { %v357_v14 = vpop.f32.mrf.mxu3 }
  0xab   : > { %v358_v15 = vadd.f32 %v839_v5, %v357_v14 }
  0xad   : > { %375 = vadd.xlane.f32.xlu0 %v358_v15 }
  0xb2   : > { %v360_v16 = vpop.f32.mrf.mxu3 }
  0xb3   : > { %v361_v18 = vadd.f32 %v839_v5, %v360_v16 }
  0xb5   : > { %377 = vadd.xlane.f32.xlu1 %v361_v18  ;;  %369 = vadd.xlane.f32.xlu0 %v351_v17 }
  0xba   : > { %v362_v19 = vpop.f32.mrf.mxu3 }
  0xbb   : > { %v363_v20 = vadd.f32 %v839_v5, %v362_v19  ;;  %v808_v5 = vld [vmem:[%s1070_s5 + $0x10] sm:$0xff] }
  0xbc   : > { %826 = vmatpush.bf16.msra.mxu2 %v808_v5  ;;  %645 = vmatpush.bf16.msrb.mxu0 %v808_v5 }
  0xbd   : > { %379 = vadd.xlane.f32.xlu1 %v363_v20  ;;  %825 = vmatpush.bf16.msra.mxu1 %v808_v5 }
  0xc0   : > { %828 = vmatpush.bf16.msra.mxu2 %v807_v8  ;;  %646 = vmatpush.bf16.msrb.mxu0 %v807_v8 }
  0xc1   : > { %827 = vmatpush.bf16.msra.mxu1 %v807_v8 }
  0xc5   : > { %371 = vadd.xlane.f32.xlu1 %v353_v21 }
 0x102   : > { %v366_v28 = vpop.xlane.xlu2 %365 }
 0x103   : > { %v381_v32 = vmul.f32 0.03125, %v366_v28 }
 0x105   : > { %v389_v36 = vsub.f32 %v346_v7, %v381_v32 }
 0x107   : > { %v938_v42 = vsel %vm399_vm1, %v389_v36, 0.0 }
 0x108   : > { %v408_v45 = vmul.f32 %v938_v42, %v938_v42 }
 0x10a   : > { %v368_v37 = vpop.xlane.xlu2 %367 }
 0x10b   : > { %v382_v40 = vmul.f32 0.03125, %v368_v37 }
 0x10d   : > { %v390_v46 = vsub.f32 %v348_v10, %v382_v40  ;;  %v806_v10 = vld [vmem:[%s1070_s5] sm:$0xff] }
 0x10e   : > { %830 = vmatpush.bf16.msra.mxu2 %v806_v10  ;;  %647 = vmatpush.bf16.msrb.mxu0 %v806_v10 }
 0x10f   : > { %v948_v52 = vsel %vm399_vm1, %v390_v46, 0.0  ;;  %829 = vmatpush.bf16.msra.mxu1 %v806_v10 }
 0x110   : > { %v409_v55 = vmul.f32 %v948_v52, %v948_v52 }
 0x118   : > { %v374_v23 = vpop.xlane.xlu0 %373 }
 0x119   : > { %v385_v25 = vmul.f32 0.03125, %v374_v23 }
 0x11b   : > { %v393_v26 = vsub.f32 %v356_v13, %v385_v25 }
 0x11d   : > { %v928_v27 = vsel %vm399_vm1, %v393_v26, 0.0 }
 0x11e   : > { %v412_v29 = vmul.f32 %v928_v27, %v928_v27 }
 0x120   : > { %v376_v30 = vpop.xlane.xlu0 %375  ;;  %424 = vadd.xlane.f32.xlu2 %v412_v29 }
 0x121   : > { %v386_v31 = vmul.f32 0.03125, %v376_v30 }
 0x123   : > { %v394_v33 = vsub.f32 %v358_v15, %v386_v31 }
 0x125   : > { %v933_v34 = vsel %vm399_vm1, %v394_v33, 0.0 }
 0x126   : > { %v413_v35 = vmul.f32 %v933_v34, %v933_v34 }
 0x128   : > { %v378_v38 = vpop.xlane.xlu1 %377  ;;  %426 = vadd.xlane.f32.xlu0 %v413_v35  ;;  %v370_v47 = vpop.xlane.xlu0 %369 }
 0x129   : > { %v387_v39 = vmul.f32 0.03125, %v378_v38  ;;  %v383_v50 = vmul.f32 0.03125, %v370_v47 }
 0x12b   : > { %v395_v41 = vsub.f32 %v361_v18, %v387_v39  ;;  %v391_v56 = vsub.f32 %v351_v17, %v383_v50  ;;  %v995_v39 = vld [vmem:[%s1068_s3] ss:$0 sm:$0xff] }
 0x12d   : > { %v941_v43 = vsel %vm399_vm1, %v395_v41, 0.0  ;;  %v958_v60 = vsel %vm399_vm1, %v391_v56, 0.0 }
 0x12e   : > { %v414_v44 = vmul.f32 %v941_v43, %v941_v43  ;;  %v410_v62 = vmul.f32 %v958_v60, %v958_v60 }
 0x130   : > { %v380_v48 = vpop.xlane.xlu1 %379  ;;  %428 = vadd.xlane.f32.xlu1 %v414_v44  ;;  %416 = vadd.xlane.f32.xlu0 %v408_v45 }
 0x131   : > { %v388_v49 = vmul.f32 0.03125, %v380_v48 }
 0x133   : > { %v396_v51 = vsub.f32 %v363_v20, %v388_v49 }
 0x135   : > { %v951_v53 = vsel %vm399_vm1, %v396_v51, 0.0  ;;  %v1007_v51 = vld [vmem:[%s1069_s4] ss:$0 sm:$0xff] }
 0x136   : > { %v415_v54 = vmul.f32 %v951_v53, %v951_v53 }
 0x138   : > { %v372_v57 = vpop.xlane.xlu1 %371  ;;  %430 = vadd.xlane.f32.xlu2 %v415_v54  ;;  %418 = vadd.xlane.f32.xlu1 %v409_v55 }
 0x139   : > { %v384_v58 = vmul.f32 0.03125, %v372_v57 }
 0x13b   : > { %v392_v59 = vsub.f32 %v353_v21, %v384_v58 }
 0x13d   : > { %v961_v61 = vsel %vm399_vm1, %v392_v59, 0.0 }
 0x13e   : > { %v411_v63 = vmul.f32 %v961_v61, %v961_v61 }
 0x140   : > { %420 = vadd.xlane.f32.xlu2 %v410_v62  ;;  %422 = vadd.xlane.f32.xlu0 %v411_v63 }
 0x193   : > { %v425_v6 = vpop.xlane.xlu2 %424 }
 0x194   : > { %v436_v7 = vmul.f32 0.03125, %v425_v6 }
 0x196   : > { %v444_v9 = vadd.f32 1e-05, %v436_v7 }
 0x198   : > { %843 = vrsqrt.f32 %v444_v9  ;;  %vm494_vm3 = vweird.f32 %v444_v9 }
 0x19b   : > { %v427_v11 = vpop.xlane.xlu0 %426 }
 0x19c   : > { %v437_v12 = vmul.f32 0.03125, %v427_v11 }
 0x19e   : > { %v844_v13 = vpop.eup %843  ;;  %v445_v14 = vadd.f32 1e-05, %v437_v12 }
 0x19f   : > { %v489_v15 = vmul.f32 %v844_v13, %v444_v9  ;;  %vm495_vm2 = vweird.f32 %v844_v13 }
 0x1a0   : > { %845 = vrsqrt.f32 %v445_v14  ;;  %vm496_vm4 = vmor %vm494_vm3, %vm495_vm2  ;;  %vm504_vm6 = vweird.f32 %v445_v14 }
 0x1a1   : > { %v490_v16 = vmul.f32 %v844_v13, %v489_v15 }
 0x1a3   : > { %v491_v17 = vmul.f32 0.5, %v490_v16  ;;  %v429_v18 = vpop.xlane.xlu1 %428  ;;  %v417_v19 = vpop.xlane.xlu0 %416 }
 0x1a4   : > { %v438_v20 = vmul.f32 0.03125, %v429_v18  ;;  %v432_v21 = vmul.f32 0.03125, %v417_v19 }
 0x1a5   : > { %v492_v22 = vsub.f32 1.5, %v491_v17 }
 0x1a6   : > { %v846_v23 = vpop.eup %845  ;;  %v446_v24 = vadd.f32 1e-05, %v438_v20  ;;  %v440_v25 = vadd.f32 1e-05, %v432_v21 }
 0x1a7   : > { %v493_v26 = vmul.f32 %v844_v13, %v492_v22  ;;  %v499_v28 = vmul.f32 %v846_v23, %v445_v14  ;;  %vm505_vm5 = vweird.f32 %v846_v23 }
 0x1a8   : > { %847 = vrsqrt.f32 %v446_v24  ;;  %vm506_vm7 = vmor %vm504_vm6, %vm505_vm5  ;;  %vm514_vm10 = vweird.f32 %v446_v24  ;;  %vm454_vm12 = vweird.f32 %v440_v25 }
 0x1a9   : > { %v500_v29 = vmul.f32 %v846_v23, %v499_v28  ;;  %849 = vrsqrt.f32 %v440_v25  ;;  %v497_v30 = vsel %vm496_vm4, %v844_v13, %v493_v26 }
 0x1aa   : > { %v532_v38 = vmul.f32 %v497_v30, %v928_v27 }
 0x1ab   : > { %v501_v31 = vmul.f32 0.5, %v500_v29  ;;  %v419_v32 = vpop.xlane.xlu1 %418  ;;  %v431_v33 = vpop.xlane.xlu2 %430 }
 0x1ac   : > { %v433_v35 = vmul.f32 0.03125, %v419_v32  ;;  %v439_v36 = vmul.f32 0.03125, %v431_v33  ;;  %v544_v50 = vmul.f32 %v995_v39, %v532_v38 }
 0x1ad   : > { %v502_v37 = vsub.f32 1.5, %v501_v31 }
 0x1ae   : > { %v848_v40 = vpop.eup %847  ;;  %v997_v41 = vadd.f32 1e-05, %v433_v35  ;;  %v999_v44 = vadd.f32 1e-05, %v439_v36  ;;  %v556_v2 = vadd.f32 %v1007_v51, %v544_v50 }
 0x1af   : > { %v850_v45 = vpop.eup %849  ;;  %v503_v46 = vmul.f32 %v846_v23, %v502_v37  ;;  %v509_v47 = vmul.f32 %v848_v40, %v446_v24  ;;  %vm515_vm8 = vweird.f32 %v848_v40 }
 0x1b0   : > { %v449_v48 = vmul.f32 %v850_v45, %v440_v25  ;;  %851 = vrsqrt.f32 %v997_v41  ;;  %vm455_vm9 = vweird.f32 %v850_v45  ;;  %vm1016_vm11 = vmor %vm514_vm10, %vm515_vm8  ;;  %v564_v14 = vmax.f32 %v556_v2, 0.0 }
 0x1b1   : > { %v507_v49 = vsel %vm506_vm7, %v846_v23, %v503_v46  ;;  %v510_v27 = vmul.f32 %v848_v40, %v509_v47  ;;  %853 = vrsqrt.f32 %v999_v44  ;;  %vm456_vm13 = vmor %vm454_vm12, %vm455_vm9  ;;  %vm464_vm0 = vweird.f32 %v997_v41 }
 0x1b2   : > { %v450_v54 = vmul.f32 %v850_v45, %v449_v48  ;;  %v533_v55 = vmul.f32 %v507_v49, %v933_v34  ;;  %vm524_vm2 = vweird.f32 %v999_v44  ;;  %vm669_vm10 = vcmask 64512  }
 0x1b3   : > { %v511_v56 = vmul.f32 0.5, %v510_v27  ;;  %v423_v57 = vpop.xlane.xlu0 %422  ;;  %v421_v58 = vpop.xlane.xlu2 %420 }
 0x1b4   : > { %v451_v59 = vmul.f32 0.5, %v450_v54  ;;  %v435_v62 = vmul.f32 0.03125, %v423_v57  ;;  %v434_v63 = vmul.f32 0.03125, %v421_v58  ;;  %v545_v0 = vmul.f32 %v995_v39, %v533_v55 }
 0x1b5   : > { %v512_v1 = vsub.f32 1.5, %v511_v56 }
 0x1b6   : > { %v852_v3 = vpop.eup %851  ;;  %v452_v4 = vsub.f32 1.5, %v451_v59  ;;  %v443_v5 = vadd.f32 1e-05, %v435_v62  ;;  %v1012_v6 = vadd.f32 1e-05, %v434_v63  ;;  %v557_v34 = vadd.f32 %v1007_v51, %v545_v0 }
 0x1b7   : > { %v854_v7 = vpop.eup %853  ;;  %v513_v8 = vmul.f32 %v848_v40, %v512_v1  ;;  %v459_v9 = vmul.f32 %v852_v3, %v997_v41  ;;  %vm465_vm14 = vweird.f32 %v852_v3 }
 0x1b8   : > { %v453_v11 = vmul.f32 %v850_v45, %v452_v4  ;;  %v519_v12 = vmul.f32 %v854_v7, %v999_v44  ;;  %855 = vrsqrt.f32 %v443_v5  ;;  %v565_v18 = vmax.f32 %v557_v34, 0.0  ;;  %vm466_vm1 = vmor %vm464_vm0, %vm465_vm14 }
 0x1b9   : > { %v460_v13 = vmul.f32 %v852_v3, %v459_v9  ;;  %857 = vrsqrt.f32 %v1012_v6  ;;  %v517_v15 = vsel %vm1016_vm11, %v848_v40, %v513_v8  ;;  %vm525_vm15 = vweird.f32 %v854_v7 }
 0x1ba   : > { %v457_v16 = vsel %vm456_vm13, %v850_v45, %v453_v11  ;;  %v520_v17 = vmul.f32 %v854_v7, %v519_v12  ;;  %v570_v22 = vpack.c.bf16 %v565_v18, %v564_v14  ;;  %v534_v24 = vmul.f32 %v517_v15, %v941_v43  ;;  %vm526_vm3 = vmor %vm524_vm2, %vm525_vm15 }
 0x1bb   : > { %v461_v19 = vmul.f32 0.5, %v460_v13  ;;  %v528_v20 = vmul.f32 %v457_v16, %v938_v42  ;;  %vm484_vm6 = vweird.f32 %v443_v5  ;;  %vm474_vm8 = vweird.f32 %v1012_v6 }
 0x1bc   : > { %v521_v21 = vmul.f32 0.5, %v520_v17  ;;  %658 = vmatmul.bf16.vlgmr.msra.gmra.mxu2 %v570_v22  ;;  %v546_v35 = vmul.f32 %v995_v39, %v534_v24 }
 0x1bd   : > { %v462_v23 = vsub.f32 1.5, %v461_v19  ;;  %v540_v32 = vmul.f32 %v995_v39, %v528_v20 }
 0x1be   : > { %v856_v25 = vpop.eup %855  ;;  %v522_v26 = vsub.f32 1.5, %v521_v21  ;;  %v558_v49 = vadd.f32 %v1007_v51, %v546_v35 }
 0x1bf   : > { %v858_v28 = vpop.eup %857  ;;  %v463_v29 = vmul.f32 %v852_v3, %v462_v23  ;;  %v479_v30 = vmul.f32 %v856_v25, %v443_v5  ;;  %v552_v44 = vadd.f32 %v1007_v51, %v540_v32  ;;  %vm485_vm4 = vweird.f32 %v856_v25 }
 0x1c0   : > { %v523_v31 = vmul.f32 %v854_v7, %v522_v26  ;;  %v469_v42 = vmul.f32 %v858_v28, %v1012_v6  ;;  %vm475_vm5 = vweird.f32 %v858_v28  ;;  %vm486_vm7 = vmor %vm484_vm6, %vm485_vm4  ;;  %v566_v58 = vmax.f32 %v558_v49, 0.0 }
 0x1c1   : > { %v467_v33 = vsel %vm466_vm1, %v852_v3, %v463_v29  ;;  %v480_v43 = vmul.f32 %v856_v25, %v479_v30  ;;  %v560_v55 = vmax.f32 %v552_v44, 0.0  ;;  %vm476_vm9 = vmor %vm474_vm8, %vm475_vm5 }
 0x1c2   : > { %v529_v36 = vmul.f32 %v467_v33, %v948_v52  ;;  %v527_v37 = vsel %vm526_vm3, %v854_v7, %v523_v31  ;;  %v470_v38 = vmul.f32 %v858_v28, %v469_v42 }
 0x1c3   : > { %v481_v40 = vmul.f32 0.5, %v480_v43  ;;  %v535_v41 = vmul.f32 %v527_v37, %v951_v53 }
 0x1c4   : > { %v471_v45 = vmul.f32 0.5, %v470_v38  ;;  %v541_v46 = vmul.f32 %v995_v39, %v529_v36 }
 0x1c5   : > { %v482_v47 = vsub.f32 1.5, %v481_v40  ;;  %v547_v48 = vmul.f32 %v995_v39, %v535_v41 }
 0x1c6   : > { %v472_v27 = vsub.f32 1.5, %v471_v45  ;;  %v553_v52 = vadd.f32 %v1007_v51, %v541_v46 }
 0x1c7   : > { %v483_v50 = vmul.f32 %v856_v25, %v482_v47  ;;  %v559_v54 = vadd.f32 %v1007_v51, %v547_v48 }
 0x1c8   : > { %v473_v53 = vmul.f32 %v858_v28, %v472_v27  ;;  %v561_v56 = vmax.f32 %v553_v52, 0.0 }
 0x1c9   : > { %v487_v57 = vsel %vm486_vm7, %v856_v25, %v483_v50  ;;  %v567_v59 = vmax.f32 %v559_v54, 0.0 }
 0x1ca   : > { %v477_v62 = vsel %vm476_vm9, %v858_v28, %v473_v53  ;;  %v568_v63 = vpack.c.bf16 %v561_v56, %v560_v55  ;;  %v531_v0 = vmul.f32 %v487_v57, %v961_v61  ;;  %v842_v61 = vld [vmem:[%s1071_s6] ss:$0 sm:$0xff] }
 0x1cb   : > { %v571_v1 = vpack.c.bf16 %v567_v59, %v566_v58  ;;  %v530_v2 = vmul.f32 %v477_v62, %v958_v60 }
 0x1cc   : > { %648 = vmatmul.bf16.vlgmr.msrb.gmra.mxu0 %v568_v63  ;;  %v543_v3 = vmul.f32 %v995_v39, %v531_v0 }
 0x1cd   : > { %v542_v4 = vmul.f32 %v995_v39, %v530_v2  ;;  %663 = vmatmul.bf16.gmra.mxu2 %v571_v1 }
 0x1ce   : > { %v555_v5 = vadd.f32 %v1007_v51, %v543_v3 }
 0x1cf   : > { %v554_v6 = vadd.f32 %v1007_v51, %v542_v4 }
 0x1d0   : > { %v563_v34 = vmax.f32 %v555_v5, 0.0 }
 0x1d1   : > { %v562_v7 = vmax.f32 %v554_v6, 0.0 }
 0x1d3   : > { %v569_v8 = vpack.c.bf16 %v563_v34, %v562_v7 }
 0x1d5   : > { %653 = vmatmul.bf16.vlgmr.msra.gmra.mxu1 %v569_v8 }
 0x23f   : > { %v659_v60 = vpop.f32.mrf.mxu2 }
 0x240   : > { %v660_v39 = vadd.f32 %v842_v61, %v659_v60 }
 0x242   : > { %674 = vst.msk [vmem:[%s280_s16 + $0x20] sm:$0xff] %vm669_vm10, %v660_v39 }
 0x247   : > { %v661_v9 = vpop.f32.mrf.mxu2 }
 0x248   : > { %v662_v10 = vadd.f32 %v842_v61, %v661_v9 }
 0x249   : > { %v649_v51 = vpop.f32.mrf.mxu0 }
 0x24a   : > { %v650_v11 = vadd.f32 %v842_v61, %v649_v51  ;;  %675 = vst.msk [vmem:[%s280_s16 + $0x28] sm:$0xff] %vm669_vm10, %v662_v10 }
 0x24c   : > { %670 = vst.msk [vmem:[%s280_s16] sm:$0xff] %vm669_vm10, %v650_v11 }
 0x250   : > { %v664_v12 = vpop.f32.mrf.mxu2 }
 0x251   : > { %v651_v13 = vpop.f32.mrf.mxu0  ;;  %v665_v14 = vadd.f32 %v842_v61, %v664_v12 }
 0x252   : > { %v652_v15 = vadd.f32 %v842_v61, %v651_v13  ;;  %v654_v16 = vpop.f32.mrf.mxu1 }
 0x253   : > { %v655_v17 = vadd.f32 %v842_v61, %v654_v16  ;;  %676 = vst.msk [vmem:[%s280_s16 + $0x30] sm:$0xff] %vm669_vm10, %v665_v14 }
 0x254   : > { %671 = vst.msk [vmem:[%s280_s16 + $0x8] sm:$0xff] %vm669_vm10, %v652_v15 }
 0x255   : > { %672 = vst.msk [vmem:[%s280_s16 + $0x10] sm:$0xff] %vm669_vm10, %v655_v17 }
 0x258   : > { %v666_v18 = vpop.f32.mrf.mxu2 }
 0x259   : > { %v667_v19 = vadd.f32 %v842_v61, %v666_v18 }
 0x25a   : > { %v656_v20 = vpop.f32.mrf.mxu1 }
 0x25b   : > { %v657_v21 = vadd.f32 %v842_v61, %v656_v20  ;;  %677 = vst.msk [vmem:[%s280_s16 + $0x38] sm:$0xff] %vm669_vm10, %v667_v19 }
 0x25d   : > { %673 = vst.msk [vmem:[%s280_s16 + $0x18] sm:$0xff] %vm669_vm10, %v657_v21 }
 0x25e PF: > { %s17_s24 = sadd.s32 1, %s865_s24  }
 0x25f   : > { %p14_p4 = scmp.ge.s32.totalorder %s17_s24, 4  }
 0x261   :  { %16 = sbr.rel (!%p14_p4) target bundleno = 1 (0x1), region = 78 }

</bundles_post_ra>
